<compile_context>
chip_gen: v6e
topology: v6e:2x2x1
jax: 0.10.0
libtpu: 0.0.40
codegen_flags: <defaults>
</compile_context>

<pallas_src>
import functools

import jax
import jax.numpy as jnp
from jax import lax
from jax.experimental import pallas as pl
from jax.experimental.pallas import tpu as pltpu

LN_EPS = 1e-5          # PyTorch LayerNorm default
LANE = 128
MAX_NODE_TILE = 512    # node rows per output tile
MAX_EDGE_TILE = 1024   # edges per reduction step
GATHER_ROWS = 8        # gathered rows per inner step -> full (8,128) vreg stores


def _round_up(a, b):
    return (a + b - 1) // b * b


def _vmem_limit_bytes():
    """Per-generation scoped-VMEM budget (v7x has only 64 MiB physical)."""
    kind = ""
    try:
        kind = jax.devices()[0].device_kind.lower()
    except Exception:
        pass
    if "v7" in kind or "7x" in kind:
        return 48 * 1024 * 1024
    return 96 * 1024 * 1024


def _pad2(a, rows, cols):
    r, c = a.shape
    return jnp.pad(a, ((0, rows - r), (0, cols - c)))


def _layernorm_padded(z, gamma, beta, true_d):
    """LayerNorm over the true feature count.

    z's padded lanes are exactly zero (padded weight columns / biases are zero).
    Centered variance with an exact correction for the (pad_d - true_d) padded
    lanes (each contributes mu^2 after centering); gamma/beta padded with zeros
    keep padded output lanes at 0.
    """
    pad_d = z.shape[-1]
    inv_d = 1.0 / true_d
    mu = jnp.sum(z, axis=-1, keepdims=True) * inv_d
    zc = z - mu
    var = (jnp.sum(zc * zc, axis=-1, keepdims=True)
           - (pad_d - true_d) * mu * mu) * inv_d
    return zc * lax.rsqrt(var + LN_EPS) * gamma + beta


# --------------------------------------------------------------------------
# Kernel 1: per-edge messages   msg = relu(x[src] + edge_attr @ We + be)
#   grid = (edge tiles,)  -- "parallel"
#   gather is index-based: src indices live in SMEM (scalar prefetch), the node
#   table is a single-buffered VMEM-resident block, and rows are gathered 8 at a
#   time so scratch stores fill whole (8,128) vregs.
# --------------------------------------------------------------------------
def _message_kernel(src_ref, x_ref, ea_ref, we_ref, be_ref, msg_ref, xs_ref, *,
                    e_tile):
    k = pl.program_id(0)
    base = k * e_tile

    def gather8(j, carry):
        off = pl.multiple_of(j * GATHER_ROWS, GATHER_ROWS)
        rows = jnp.concatenate(
            [x_ref[pl.ds(src_ref[base + off + t], 1), :]
             for t in range(GATHER_ROWS)], axis=0)
        xs_ref[pl.ds(off, GATHER_ROWS), :] = rows
        return carry

    lax.fori_loop(0, e_tile // GATHER_ROWS, gather8, 0)

    # edge Linear on the MXU (bf16 operands, f32 accumulation)
    e = jnp.dot(ea_ref[...], we_ref[...],
                preferred_element_type=jnp.float32) + be_ref[...]
    msg_ref[...] = jnp.maximum(xs_ref[...] + e, 0.0).astype(msg_ref.dtype)


# --------------------------------------------------------------------------
# Kernel 2: scatter-add over (tgt-sorted) edge tiles + GINE MLP + ReLU/LayerNorm
#   grid = (node tiles "parallel", edge tiles "arbitrary" reduction)
#   Only the edge tiles overlapping node tile i are processed (k < tc[i]); the
#   clamped index_map keeps skipped steps on the previous block (DMA elided).
# --------------------------------------------------------------------------
def _scatter_accumulate(tc_ref, msg_ref, tgt_ref, acc_ref, *, n_tile):
    i = pl.program_id(0)
    k = pl.program_id(1)

    @pl.when(k == 0)
    def _():
        acc_ref[...] = jnp.zeros_like(acc_ref)

    @pl.when(k < tc_ref[i])
    def _():
        # (n_tile,1) iota broadcast-compared against the (1, e_tile) target row.
        node_ids = i * n_tile + lax.broadcasted_iota(jnp.int32, (n_tile, 1), 0)
        onehot = (node_ids == tgt_ref[...]).astype(jnp.bfloat16)   # exact 0/1
        acc_ref[...] += jnp.dot(onehot, msg_ref[...],
                                preferred_element_type=jnp.float32)


def _gine_mlp(h, aggr, w1, b1, g1, bt1, w2, b2, gn, bn, true_h, true_o):
    z = h + aggr                                                      # eps = 0
    z = jnp.dot(z.astype(jnp.bfloat16), w1,
                preferred_element_type=jnp.float32) + b1              # Lin(D, 2D)
    z = jnp.maximum(_layernorm_padded(z, g1, bt1, true_h), 0.0)       # LN(2D)+ReLU
    z = jnp.dot(z.astype(jnp.bfloat16), w2,
                preferred_element_type=jnp.float32) + b2              # Lin(2D, Dout)
    # post-conv ReLU + norm1/norm2 LayerNorm of the module
    return _layernorm_padded(jnp.maximum(z, 0.0), gn, bn, true_o)


def _scatter_mlp_kernel(ts_ref, tc_ref, h_ref, msg_ref, tgt_ref,
                        w1_ref, b1_ref, g1_ref, bt1_ref,
                        w2_ref, b2_ref, gn_ref, bn_ref,
                        out_ref, acc_ref, *, n_tile, true_h, true_o):
    del ts_ref  # only used by the index_maps
    _scatter_accumulate(tc_ref, msg_ref, tgt_ref, acc_ref, n_tile=n_tile)

    @pl.when(pl.program_id(1) == pl.num_programs(1) - 1)
    def _():
        out_ref[...] = _gine_mlp(
            h_ref[...], acc_ref[...],
            w1_ref[...], b1_ref[...], g1_ref[...], bt1_ref[...],
            w2_ref[...], b2_ref[...], gn_ref[...], bn_ref[...],
            true_h, true_o)


def _scatter_mlp_final_kernel(ts_ref, tc_ref, h_ref, msg_ref, tgt_ref,
                              w1_ref, b1_ref, g1_ref, bt1_ref,
                              w2_ref, b2_ref, gn_ref, bn_ref,
                              wl_ref, bl_ref, out_ref, acc_ref, *,
                              n_tile, true_h, true_o):
    del ts_ref
    _scatter_accumulate(tc_ref, msg_ref, tgt_ref, acc_ref, n_tile=n_tile)

    @pl.when(pl.program_id(1) == pl.num_programs(1) - 1)
    def _():
        h1 = h_ref[...]
        h2 = _gine_mlp(
            h1, acc_ref[...],
            w1_ref[...], b1_ref[...], g1_ref[...], bt1_ref[...],
            w2_ref[...], b2_ref[...], gn_ref[...], bn_ref[...],
            true_h, true_o)
        # final Linear over concat([h1, h2]): single K = dp+op contraction
        # (fills the 256-deep MXU on v6e/v7x); lane concat is once per node tile.
        hcat = jnp.concatenate([h1, h2], axis=-1).astype(jnp.bfloat16)
        out = jnp.dot(hcat, wl_ref[...],
                      preferred_element_type=jnp.float32) + bl_ref[...]
        out_ref[...] = jnp.maximum(out, 0.0)


# --------------------------------------------------------------------------
# pallas_call wrappers
# --------------------------------------------------------------------------
def _run_message(x_pad, ea_pad, src_sorted, we, be, *, edge_tile, vmem_limit):
    n_pad, dp = x_pad.shape
    e_pad = ea_pad.shape[0]
    grid = (e_pad // edge_tile,)
    cost = pl.CostEstimate(
        flops=2 * e_pad * dp * dp + 2 * e_pad * dp,
        transcendentals=0,
        bytes_accessed=(4 * n_pad * dp            # node table (read once, 1-buffered)
                        + 2 * e_pad * dp          # edge_attr (bf16)
                        + 2 * e_pad * dp          # msg out (bf16)
                        + 2 * dp * dp + 4 * dp + 4 * e_pad),
    )
    resident = pl.Buffered(1)   # constant index map -> never re-fetched
    # TODO(synk): for node tables larger than VMEM, replace the resident-x gather
    # with a manual double-buffered DMA gather from HBM (memory_space=pl.ANY).
    return pl.pallas_call(
        functools.partial(_message_kernel, e_tile=edge_tile),
        grid_spec=pltpu.PrefetchScalarGridSpec(
            num_scalar_prefetch=1,
            grid=grid,
            in_specs=[
                pl.BlockSpec((n_pad, dp), lambda k, src: (0, 0),
                             pipeline_mode=resident),                    # x (resident)
                pl.BlockSpec((edge_tile, dp), lambda k, src: (k, 0)),    # edge_attr
                pl.BlockSpec((dp, dp), lambda k, src: (0, 0),
                             pipeline_mode=resident),                    # We
                pl.BlockSpec((1, dp), lambda k, src: (0, 0),
                             pipeline_mode=resident),                    # be
            ],
            out_specs=pl.BlockSpec((edge_tile, dp), lambda k, src: (k, 0)),
            scratch_shapes=[pltpu.VMEM((edge_tile, dp), jnp.float32)],
        ),
        out_shape=jax.ShapeDtypeStruct((e_pad, dp), jnp.bfloat16),
        compiler_params=pltpu.CompilerParams(
            dimension_semantics=("parallel",),
            vmem_limit_bytes=vmem_limit,
        ),
        cost_estimate=cost,
    )(src_sorted, x_pad, ea_pad, we, be)


def _run_scatter_mlp(h_pad, msg, tgt_row, tile_start, tile_count, weights, *,
                     node_tile, edge_tile, true_h, true_o, vmem_limit,
                     final_weights=None):
    n_pad, dp = h_pad.shape
    e_pad = msg.shape[0]
    w1, b1, g1, bt1, w2, b2, gn, bn = weights
    hp = w1.shape[1]
    op = w2.shape[1]
    n_node_tiles = n_pad // node_tile
    n_edge_tiles = e_pad // edge_tile
    grid = (n_node_tiles, n_edge_tiles)
    last_e = n_edge_tiles - 1

    # tgt-sorted edges: node tile i only needs edge tiles [ts[i], ts[i]+tc[i]).
    # Out-of-range steps clamp to the previous block index (DMA elided) and the
    # kernel skips the accumulate via k < tc[i].
    def msg_map(i, k, ts, tc):
        return (jnp.minimum(ts[i] + k, last_e), 0)

    def tgt_map(i, k, ts, tc):
        return (0, jnp.minimum(ts[i] + k, last_e))

    const = lambda i, k, ts, tc: (0, 0)
    resident = pl.Buffered(1)
    wspec = lambda shape: pl.BlockSpec(shape, const, pipeline_mode=resident)

    in_specs = [
        pl.BlockSpec((node_tile, dp), lambda i, k, ts, tc: (i, 0)),   # h tile
        pl.BlockSpec((edge_tile, dp), msg_map),                       # msg tile (bf16)
        pl.BlockSpec((1, edge_tile), tgt_map),                        # tgt row (lanes)
        wspec((dp, hp)), wspec((1, hp)), wspec((1, hp)), wspec((1, hp)),
        wspec((hp, op)), wspec((1, op)), wspec((1, op)), wspec((1, op)),
    ]
    inputs = [h_pad, msg, tgt_row, w1, b1, g1, bt1, w2, b2, gn, bn]

    if final_weights is None:
        kern = functools.partial(_scatter_mlp_kernel, n_tile=node_tile,
                                 true_h=true_h, true_o=true_o)
    else:
        wl, bl = final_weights
        in_specs += [wspec((dp + op, op)), wspec((1, op))]
        inputs += [wl, bl]
        kern = functools.partial(_scatter_mlp_final_kernel, n_tile=node_tile,
                                 true_h=true_h, true_o=true_o)

    # each edge tile is visited ~once overall (plus at most one boundary revisit
    # per node tile) thanks to the tgt-sort.
    visited_edges = e_pad + n_node_tiles * edge_tile
    scatter_flops = 2 * visited_edges * node_tile * dp
    mlp_flops = 2 * n_pad * (dp * hp + hp * op)
    if final_weights is not None:
        mlp_flops += 2 * n_pad * (dp + op) * op
    cost = pl.CostEstimate(
        flops=scatter_flops + mlp_flops,
        transcendentals=4 * n_pad,
        bytes_accessed=(4 * n_pad * dp                  # h (f32)
                        + 2 * visited_edges * dp        # msg (bf16, incl. revisits)
                        + 4 * visited_edges             # tgt row
                        + 4 * n_pad * op                # out (f32)
                        + 2 * (dp * hp + hp * op + (dp + op) * op)),
    )

    return pl.pallas_call(
        kern,
        grid_spec=pltpu.PrefetchScalarGridSpec(
            num_scalar_prefetch=2,
            grid=grid,
            in_specs=in_specs,
            out_specs=pl.BlockSpec((node_tile, op), lambda i, k, ts, tc: (i, 0)),
            scratch_shapes=[pltpu.VMEM((node_tile, dp), jnp.float32)],
        ),
        out_shape=jax.ShapeDtypeStruct((n_pad, op), jnp.float32),
        compiler_params=pltpu.CompilerParams(
            dimension_semantics=("parallel", "arbitrary"),
            vmem_limit_bytes=vmem_limit,
        ),
        cost_estimate=cost,
    )(tile_start, tile_count, *inputs)


def graph_pooling_forward(x, edge_index, edge_attr, params):
    """x: (N, D) f32, edge_index: (2, E) i32, edge_attr: (E, D) f32."""
    n, emb_dim = x.shape
    e = edge_attr.shape[0]
    out_dim = params['bl'].shape[-1]
    hid_dim = params['b11'].shape[-1]          # 2 * emb_dim

    # lane-dense padded feature widths (multiples of 128)
    dp = _round_up(emb_dim, LANE)
    hp = _round_up(hid_dim, LANE)
    op = _round_up(out_dim, LANE)

    # row padding / tile sizes (second-minor dims divisible by 8)
    if n <= MAX_NODE_TILE:
        n_pad = _round_up(n, 8)
        node_tile = n_pad
    else:
        n_pad = _round_up(n, MAX_NODE_TILE)
        node_tile = MAX_NODE_TILE
    if e <= MAX_EDGE_TILE:
        e_pad = _round_up(e, GATHER_ROWS)
        edge_tile = e_pad
    else:
        e_pad = _round_up(e, MAX_EDGE_TILE)
        edge_tile = MAX_EDGE_TILE

    vmem_limit = _vmem_limit_bytes()
    # Enforce that the single-buffered resident node table actually fits.
    if n_pad * dp * 4 > vmem_limit // 2:
        # TODO(synk): gather x[src] from HBM (memory_space=pl.ANY) with a manual
        # double-buffered make_async_copy instead of the VMEM-resident table.
        raise NotImplementedError(
            "node table too large for the VMEM-resident gather path")

    x_pad = _pad2(x.astype(jnp.float32), n_pad, dp)
    ea_pad = _pad2(edge_attr.astype(jnp.float32), e_pad, dp)

    src = edge_index[0].astype(jnp.int32)
    tgt = edge_index[1].astype(jnp.int32)
    # padded edges: src -> node 0 (valid row); tgt -> n_pad (sorts last, never
    # matches any node id, so padded messages are dropped by the one-hot).
    src_pad = jnp.concatenate([src, jnp.zeros((e_pad - e,), jnp.int32)])
    tgt_pad = jnp.concatenate([tgt, jnp.full((e_pad - e,), n_pad, jnp.int32)])

    # sort edges by target so every node tile touches a contiguous edge-tile range
    order = jnp.argsort(tgt_pad)
    src_s = src_pad[order]
    tgt_s = tgt_pad[order]
    ea_s = ea_pad[order].astype(jnp.bfloat16)
    tgt_row = tgt_s.reshape(1, e_pad)

    n_node_tiles = n_pad // node_tile
    bounds = jnp.arange(n_node_tiles + 1, dtype=jnp.int32) * node_tile
    pos = jnp.searchsorted(tgt_s, bounds).astype(jnp.int32)
    lo, hi = pos[:-1], pos[1:]
    tile_start = (lo // edge_tile).astype(jnp.int32)
    tile_end = ((hi + edge_tile - 1) // edge_tile).astype(jnp.int32)
    tile_count = jnp.where(hi > lo, tile_end - tile_start, 0).astype(jnp.int32)

    p = params
    bf = jnp.bfloat16
    we1 = _pad2(p['we1'], dp, dp).astype(bf); be1 = _pad2(p['be1'], 1, dp)
    w11 = _pad2(p['w11'], dp, hp).astype(bf); b11 = _pad2(p['b11'], 1, hp)
    g11 = _pad2(p['g11'], 1, hp); bt11 = _pad2(p['bt11'], 1, hp)
    w12 = _pad2(p['w12'], hp, dp).astype(bf); b12 = _pad2(p['b12'], 1, dp)
    gn1 = _pad2(p['gn1'], 1, dp); bn1 = _pad2(p['bn1'], 1, dp)

    we2 = _pad2(p['we2'], dp, dp).astype(bf); be2 = _pad2(p['be2'], 1, dp)
    w21 = _pad2(p['w21'], dp, hp).astype(bf); b21 = _pad2(p['b21'], 1, hp)
    g21 = _pad2(p['g21'], 1, hp); bt21 = _pad2(p['bt21'], 1, hp)
    w22 = _pad2(p['w22'], hp, op).astype(bf); b22 = _pad2(p['b22'], 1, op)
    gn2 = _pad2(p['gn2'], 1, op); bn2 = _pad2(p['bn2'], 1, op)

    # stacked final weight: concat([h1, h2], -1) @ [[wl1], [wl2]]
    wl = jnp.concatenate([_pad2(p['wl1'], dp, op), _pad2(p['wl2'], op, op)],
                         axis=0).astype(bf)
    bl = _pad2(p['bl'], 1, op)

    # ---- layer 1 : conv1 + relu + norm1 ----
    msg1 = _run_message(x_pad, ea_s, src_s, we1, be1,
                        edge_tile=edge_tile, vmem_limit=vmem_limit)
    h1 = _run_scatter_mlp(x_pad, msg1, tgt_row, tile_start, tile_count,
                          (w11, b11, g11, bt11, w12, b12, gn1, bn1),
                          node_tile=node_tile, edge_tile=edge_tile,
                          true_h=hid_dim, true_o=emb_dim,
                          vmem_limit=vmem_limit)                     # (n_pad, dp)

    # ---- layer 2 : conv2 + relu + norm2 + fused final Linear + ReLU ----
    msg2 = _run_message(h1, ea_s, src_s, we2, be2,
                        edge_tile=edge_tile, vmem_limit=vmem_limit)
    out = _run_scatter_mlp(h1, msg2, tgt_row, tile_start, tile_count,
                           (w21, b21, g21, bt21, w22, b22, gn2, bn2),
                           node_tile=node_tile, edge_tile=edge_tile,
                           true_h=hid_dim, true_o=out_dim,
                           vmem_limit=vmem_limit,
                           final_weights=(wl, bl))                   # (n_pad, op)

    return out[:n, :out_dim]


# --------------------------------------------------------------------------
# Pure-JAX reference & parameter construction (for the self-check)
# --------------------------------------------------------------------------
def _jax_reference(x, edge_index, edge_attr, params):
    def ln(h, g, b):
        mu = jnp.mean(h, -1, keepdims=True)
        var = jnp.mean((h - mu) ** 2, -1, keepdims=True)
        return (h - mu) / jnp.sqrt(var + LN_EPS) * g + b

    def gine(h, we, be, w1, b1, g1, bt1, w2, b2):
        e = edge_attr @ we + be
        msg = jax.nn.relu(h[edge_index[0]] + e)
        aggr = jnp.zeros_like(h[:, :we.shape[1]]).at[edge_index[1]].add(msg)
        z = h + aggr
        z = jax.nn.relu(ln(z @ w1 + b1, g1, bt1))
        return z @ w2 + b2

    p = params
    h1 = ln(jax.nn.relu(gine(x, p['we1'], p['be1'], p['w11'], p['b11'],
                             p['g11'], p['bt11'], p['w12'], p['b12'])),
            p['gn1'], p['bn1'])
    h2 = ln(jax.nn.relu(gine(h1, p['we2'], p['be2'], p['w21'], p['b21'],
                             p['g21'], p['bt21'], p['w22'], p['b22'])),
            p['gn2'], p['bn2'])
    h = jnp.concatenate([h1, h2], -1)
    wl = jnp.concatenate([p['wl1'], p['wl2']], 0)
    return jax.nn.relu(h @ wl + p['bl'])


def make_params(key, emb_dim, out_dim):
    ks = iter(jax.random.split(key, 32))
    f = lambda *s: (jax.random.normal(next(ks), s, jnp.float32) * 0.1)
    return {
        'we1': f(emb_dim, emb_dim), 'be1': f(1, emb_dim),
        'w11': f(emb_dim, 2 * emb_dim), 'b11': f(1, 2 * emb_dim),
        'g11': jnp.ones((1, 2 * emb_dim), jnp.float32),
        'bt11': jnp.zeros((1, 2 * emb_dim), jnp.float32),
        'w12': f(2 * emb_dim, emb_dim), 'b12': f(1, emb_dim),
        'gn1': jnp.ones((1, emb_dim), jnp.float32),
        'bn1': jnp.zeros((1, emb_dim), jnp.float32),
        'we2': f(emb_dim, emb_dim), 'be2': f(1, emb_dim),
        'w21': f(emb_dim, 2 * emb_dim), 'b21': f(1, 2 * emb_dim),
        'g21': jnp.ones((1, 2 * emb_dim), jnp.float32),
        'bt21': jnp.zeros((1, 2 * emb_dim), jnp.float32),
        'w22': f(2 * emb_dim, out_dim), 'b22': f(1, out_dim),
        'gn2': jnp.ones((1, out_dim), jnp.float32),
        'bn2': jnp.zeros((1, out_dim), jnp.float32),
        'wl1': f(emb_dim, out_dim), 'wl2': f(out_dim, out_dim), 'bl': f(1, out_dim),
    }


if __name__ == "__main__":
    emb_dim, out_dim = 32, 32
    n_nodes, n_edges = 8, 16

    key = jax.random.PRNGKey(0)
    k_x, k_e, k_s, k_t, k_p = jax.random.split(key, 5)

    x = jax.random.normal(k_x, (n_nodes, emb_dim), jnp.float32)
    edge_attr = jax.random.normal(k_e, (n_edges, emb_dim), jnp.float32)
    src = jax.random.randint(k_s, (n_edges,), 0, n_nodes, jnp.int32)
    tgt = jax.random.randint(k_t, (n_edges,), 0, n_nodes, jnp.int32)
    edge_index = jnp.stack([src, tgt], axis=0)      # (2, E) like PyG

    params = make_params(k_p, emb_dim, out_dim)

    out = graph_pooling_forward(x, edge_index, edge_attr, params)
    out = jax.block_until_ready(out)

    ref = _jax_reference(x, edge_index, edge_attr, params)
    assert out.shape == (n_nodes, out_dim)
    # tolerance loosened vs the f32 reference: all matmuls feed the MXU with bf16
    # operands (f32 accumulation); the one-hot scatter itself is exact 0/1.
    assert jnp.allclose(out, ref, atol=5e-2, rtol=5e-2), "mismatch vs JAX reference"

    print("KERNEL_OK")
</pallas_src>

<mosaic_0001>
module attributes {stable_mosaic.version = 11 : i64} {
  func.func @_message_kernel(%arg0: i32, %arg1: memref<16xi32, #tpu.memory_space<smem>>, %arg2: memref<8x128xf32, #tpu.memory_space<vmem>>, %arg3: memref<16x128xbf16, #tpu.memory_space<vmem>>, %arg4: memref<128x128xbf16, #tpu.memory_space<vmem>>, %arg5: memref<1x128xf32, #tpu.memory_space<vmem>>, %arg6: memref<16x128xbf16, #tpu.memory_space<vmem>>, %arg7: memref<16x128xf32, #tpu.memory_space<vmem>>) attributes {dimension_semantics = [#tpu.dimension_semantics<parallel>], iteration_bounds = array<i64: 1>, scalar_prefetch = 1 : i64, scratch_operands = 1 : i64, tpu.core_type = #tpu.core_type<tc>, window_params = [{pipeline_mode = #tpu.pipeline_mode<synchronous>, transform_indices = @transform_0, window_bounds = array<i64: 8, 128>}, {transform_indices = @transform_1, window_bounds = array<i64: 16, 128>}, {pipeline_mode = #tpu.pipeline_mode<synchronous>, transform_indices = @transform_2, window_bounds = array<i64: 128, 128>}, {pipeline_mode = #tpu.pipeline_mode<synchronous>, transform_indices = @transform_3, window_bounds = array<i64: 1, 128>}, {transform_indices = @transform_4, window_bounds = array<i64: 16, 128>}]} {
    %c16_i32 = arith.constant 16 : i32
    %0 = arith.muli %arg0, %c16_i32 : i32
    %c0_i32 = arith.constant 0 : i32
    %c2_i32 = arith.constant 2 : i32
    %1 = arith.addi %c0_i32, %c2_i32 : i32
    %c1_i32 = arith.constant 1 : i32
    scf.for %arg8 = %c0_i32 to %1 step %c1_i32  : i32 {
      %c8_i32 = arith.constant 8 : i32
      %14 = arith.muli %arg8, %c8_i32 : i32
      %15 = tpu.assume_multiple %14, 8 : i32
      %16 = arith.addi %0, %15 : i32
      %c0_i32_11 = arith.constant 0 : i32
      %17 = arith.addi %16, %c0_i32_11 : i32
      %18 = arith.index_cast %17 : i32 to index
      %19 = memref.load %arg1[%18] : memref<16xi32, #tpu.memory_space<smem>>
      %20 = arith.index_cast %19 : i32 to index
      %c0_12 = arith.constant 0 : index
      %21 = vector.load %arg2[%20, %c0_12] : memref<8x128xf32, #tpu.memory_space<vmem>>, vector<1x128xf32>
      %22 = arith.addi %0, %15 : i32
      %c1_i32_13 = arith.constant 1 : i32
      %23 = arith.addi %22, %c1_i32_13 : i32
      %24 = arith.index_cast %23 : i32 to index
      %25 = memref.load %arg1[%24] : memref<16xi32, #tpu.memory_space<smem>>
      %26 = arith.index_cast %25 : i32 to index
      %c0_14 = arith.constant 0 : index
      %27 = vector.load %arg2[%26, %c0_14] : memref<8x128xf32, #tpu.memory_space<vmem>>, vector<1x128xf32>
      %28 = arith.addi %0, %15 : i32
      %c2_i32_15 = arith.constant 2 : i32
      %29 = arith.addi %28, %c2_i32_15 : i32
      %30 = arith.index_cast %29 : i32 to index
      %31 = memref.load %arg1[%30] : memref<16xi32, #tpu.memory_space<smem>>
      %32 = arith.index_cast %31 : i32 to index
      %c0_16 = arith.constant 0 : index
      %33 = vector.load %arg2[%32, %c0_16] : memref<8x128xf32, #tpu.memory_space<vmem>>, vector<1x128xf32>
      %34 = arith.addi %0, %15 : i32
      %c3_i32 = arith.constant 3 : i32
      %35 = arith.addi %34, %c3_i32 : i32
      %36 = arith.index_cast %35 : i32 to index
      %37 = memref.load %arg1[%36] : memref<16xi32, #tpu.memory_space<smem>>
      %38 = arith.index_cast %37 : i32 to index
      %c0_17 = arith.constant 0 : index
      %39 = vector.load %arg2[%38, %c0_17] : memref<8x128xf32, #tpu.memory_space<vmem>>, vector<1x128xf32>
      %40 = arith.addi %0, %15 : i32
      %c4_i32 = arith.constant 4 : i32
      %41 = arith.addi %40, %c4_i32 : i32
      %42 = arith.index_cast %41 : i32 to index
      %43 = memref.load %arg1[%42] : memref<16xi32, #tpu.memory_space<smem>>
      %44 = arith.index_cast %43 : i32 to index
      %c0_18 = arith.constant 0 : index
      %45 = vector.load %arg2[%44, %c0_18] : memref<8x128xf32, #tpu.memory_space<vmem>>, vector<1x128xf32>
      %46 = arith.addi %0, %15 : i32
      %c5_i32 = arith.constant 5 : i32
      %47 = arith.addi %46, %c5_i32 : i32
      %48 = arith.index_cast %47 : i32 to index
      %49 = memref.load %arg1[%48] : memref<16xi32, #tpu.memory_space<smem>>
      %50 = arith.index_cast %49 : i32 to index
      %c0_19 = arith.constant 0 : index
      %51 = vector.load %arg2[%50, %c0_19] : memref<8x128xf32, #tpu.memory_space<vmem>>, vector<1x128xf32>
      %52 = arith.addi %0, %15 : i32
      %c6_i32 = arith.constant 6 : i32
      %53 = arith.addi %52, %c6_i32 : i32
      %54 = arith.index_cast %53 : i32 to index
      %55 = memref.load %arg1[%54] : memref<16xi32, #tpu.memory_space<smem>>
      %56 = arith.index_cast %55 : i32 to index
      %c0_20 = arith.constant 0 : index
      %57 = vector.load %arg2[%56, %c0_20] : memref<8x128xf32, #tpu.memory_space<vmem>>, vector<1x128xf32>
      %58 = arith.addi %0, %15 : i32
      %c7_i32 = arith.constant 7 : i32
      %59 = arith.addi %58, %c7_i32 : i32
      %60 = arith.index_cast %59 : i32 to index
      %61 = memref.load %arg1[%60] : memref<16xi32, #tpu.memory_space<smem>>
      %62 = arith.index_cast %61 : i32 to index
      %c0_21 = arith.constant 0 : index
      %63 = vector.load %arg2[%62, %c0_21] : memref<8x128xf32, #tpu.memory_space<vmem>>, vector<1x128xf32>
      %64 = tpu.concatenate %21, %27, %33, %39, %45, %51, %57, %63 in 0 : vector<1x128xf32>, vector<1x128xf32>, vector<1x128xf32>, vector<1x128xf32>, vector<1x128xf32>, vector<1x128xf32>, vector<1x128xf32>, vector<1x128xf32> -> vector<8x128xf32>
      %65 = arith.index_cast %15 : i32 to index
      %c0_22 = arith.constant 0 : index
      %66 = vector.load %arg7[%65, %c0_22] : memref<16x128xf32, #tpu.memory_space<vmem>>, vector<8x128xf32>
      tpu.vector_store %arg7[%65, %c0_22], %64 {strides = array<i32>} : memref<16x128xf32, #tpu.memory_space<vmem>>, vector<8x128xf32>,
    }
    %c2_i32_0 = arith.constant 2 : i32
    %c0 = arith.constant 0 : index
    %c0_1 = arith.constant 0 : index
    %2 = vector.load %arg3[%c0, %c0_1] : memref<16x128xbf16, #tpu.memory_space<vmem>>, vector<16x128xbf16>
    %c0_2 = arith.constant 0 : index
    %c0_3 = arith.constant 0 : index
    %3 = vector.load %arg4[%c0_2, %c0_3] : memref<128x128xbf16, #tpu.memory_space<vmem>>, vector<128x128xbf16>
    %cst = arith.constant dense<0.000000e+00> : vector<16x128xf32>
    %4 = tpu.matmul %2, %3, %cst {dimension_numbers = #tpu.dot_dimension_numbers<[1], [0], [0], [1], [0, 0, 1, 1], [], []>} : vector<16x128xbf16>, vector<128x128xbf16>, vector<16x128xf32> -> vector<16x128xf32>
    %c0_4 = arith.constant 0 : index
    %c0_5 = arith.constant 0 : index
    %5 = vector.load %arg5[%c0_4, %c0_5] : memref<1x128xf32, #tpu.memory_space<vmem>>, vector<1x128xf32>
    %6 = vector.broadcast %5 : vector<1x128xf32> to vector<16x128xf32>
    %7 = arith.addf %4, %6 : vector<16x128xf32>
    %c0_6 = arith.constant 0 : index
    %c0_7 = arith.constant 0 : index
    %8 = vector.load %arg7[%c0_6, %c0_7] : memref<16x128xf32, #tpu.memory_space<vmem>>, vector<16x128xf32>
    %9 = arith.addf %8, %7 : vector<16x128xf32>
    %cst_8 = arith.constant 0.000000e+00 : f32
    %10 = vector.broadcast %cst_8 : f32 to vector<16x128xf32>
    %11 = arith.maximumf %9, %10 : vector<16x128xf32>
    %12 = arith.truncf %11 : vector<16x128xf32> to vector<16x128xbf16>
    %c0_9 = arith.constant 0 : index
    %c0_10 = arith.constant 0 : index
    %13 = vector.load %arg6[%c0_9, %c0_10] : memref<16x128xbf16, #tpu.memory_space<vmem>>, vector<16x128xbf16>
    tpu.vector_store %arg6[%c0_9, %c0_10], %12 {strides = array<i32>} : memref<16x128xbf16, #tpu.memory_space<vmem>>, vector<16x128xbf16>,
    return
  }
  func.func @transform_0(%arg0: i32, %arg1: memref<16xi32, #tpu.memory_space<smem>>) -> (i32, i32) {
    %c0_i32 = arith.constant 0 : i32
    %c0_i32_0 = arith.constant 0 : i32
    %c0_i32_1 = arith.constant 0 : i32
    return %c0_i32, %c0_i32_0 : i32, i32
  }
  func.func @transform_1(%arg0: i32, %arg1: memref<16xi32, #tpu.memory_space<smem>>) -> (i32, i32) {
    %c0_i32 = arith.constant 0 : i32
    %c0_i32_0 = arith.constant 0 : i32
    return %arg0, %c0_i32 : i32, i32
  }
  func.func @transform_2(%arg0: i32, %arg1: memref<16xi32, #tpu.memory_space<smem>>) -> (i32, i32) {
    %c0_i32 = arith.constant 0 : i32
    %c0_i32_0 = arith.constant 0 : i32
    %c0_i32_1 = arith.constant 0 : i32
    return %c0_i32, %c0_i32_0 : i32, i32
  }
  func.func @transform_3(%arg0: i32, %arg1: memref<16xi32, #tpu.memory_space<smem>>) -> (i32, i32) {
    %c0_i32 = arith.constant 0 : i32
    %c0_i32_0 = arith.constant 0 : i32
    %c0_i32_1 = arith.constant 0 : i32
    return %c0_i32, %c0_i32_0 : i32, i32
  }
  func.func @transform_4(%arg0: i32, %arg1: memref<16xi32, #tpu.memory_space<smem>>) -> (i32, i32) {
    %c0_i32 = arith.constant 0 : i32
    %c0_i32_0 = arith.constant 0 : i32
    return %arg0, %c0_i32 : i32, i32
  }
}

</mosaic_0001>

<bundles_post_ra>
// kernel: tpu_custom_call.1
= control target key start
LH: loop header
LB: loop body
LE: loop exit
PB: predicated region body
PF: predicated region fallthrough
CT: control target
= control target key end

     0   :  { %s488_s18 = smov [#allocation4]   ;;  %s575_s0 = inlined_call_operand.hbm [shape: s32[16], index: 0, kind: input, shape index: {}]   ;;  %s576_s1 = inlined_call_operand.hbm [shape: f32[8,128], index: 1, kind: input, shape index: {}]   ;;  %s577_s2 = inlined_call_operand.hbm [shape: bf16[16,128], index: 2, kind: input, shape index: {}]   ;;  %s578_s3 = inlined_call_operand.hbm [shape: bf16[128,128], index: 3, kind: input, shape index: {}]   ;;  %s579_s4 = inlined_call_operand.vmem [shape: f32[1,128], index: 4, kind: input, shape index: {}]   ;;  %s580_s5 = inlined_call_operand.hbm [shape: bf16[16,128], index: 5, kind: output, shape index: {}]  }
   0x1   :  { %11 = dma.hbm_to_smem %s575_s0, 16, %s488_s18, [#allocation3] }
   0x2   :  { %476 = dma.done.wait [#allocation3], 16 }
   0x3   :  { %477 = vsyncadd [#allocation3], 4294967280 }
   0x4   :  { %13 = sfence }
   0x5   :  { %14 = vsyncpa [#allocation6], 0 }
   0x6   :  { %15 = vsyncpa [#allocation9], 0 }
   0x7   :  { %16 = vsyncpa [#allocation7], 0  ;;  %s489_s21 = smov [#allocation8]  }
   0x8   :  { %s32_s22 = sshll.u32 %s489_s21, 4  ;;  %s33_s22 = int_to_ptr.vmem [resolvable:$true] %s32_s22 }
   0x9   :  { %s400_s23 = scalar_lea.vmem %s33_s22, 128  ;;  %p405_p1 = scmp.lt.s32.totalorder %s33_s22, %s33_s22 }
   0xa   :  { %p401_p0 = scmp.ne.s32.totalorder %s33_s22, %s400_s23  ;;  %p406_p2 = scmp.lt.s32.totalorder %s400_s23, %s400_s23 }
   0xc   :  { %p407_p3 = por %p406_p2, %p405_p1 }
   0xe   :  { %p408_p4 = pnand %p407_p3, %p401_p0 }
  0x10   :  { %411 = shalt.err (!%p408_p4)
}
  0x11   :  { %s490_s24 = smov 64   ;;  %s491_s25 = smov 4  }
  0x12   :  { %38 = dma.hbm_to_vmem [thread:$0]  %s577_s2, 128, %s33_s22, [#allocation9], %s490_s24, %s490_s24, %s491_s25  }
  0x13   :  { %s492_s27 = smov [#allocation5]   ;;  %s493_s29 = smov [#allocation10]  }
  0x14   :  { %s23_s28 = sshll.u32 %s492_s27, 4  ;;  %s44_s30 = sshll.u32 %s493_s29, 4  ;;  %s24_s28 = int_to_ptr.vmem [resolvable:$true] %s23_s28  ;;  %s45_s30 = int_to_ptr.vmem [resolvable:$true] %s44_s30 }
  0x15   :  { %s420_s6 = scalar_lea.vmem %s24_s28, 128  ;;  %p425_p6 = scmp.lt.s32.totalorder %s24_s28, %s24_s28 }
  0x16   :  { %p421_p5 = scmp.ne.s32.totalorder %s24_s28, %s420_s6  ;;  %p426_p7 = scmp.lt.s32.totalorder %s420_s6, %s420_s6 }
  0x18   :  { %p427_p8 = por %p426_p7, %p425_p6 }
  0x1a   :  { %p428_p9 = pnand %p427_p8, %p421_p5 }
  0x1c   :  { %431 = shalt.err (!%p428_p9)
}
  0x1d   :  { %26 = dma.hbm_to_vmem [thread:$0]  %s576_s1, 128, %s24_s28, [#allocation6]  }
  0x1e   :  { %s440_s9 = scalar_lea.vmem %s45_s30, 1024  ;;  %p445_p11 = scmp.lt.s32.totalorder %s45_s30, %s45_s30 }
  0x1f   :  { %p441_p10 = scmp.ne.s32.totalorder %s45_s30, %s440_s9  ;;  %p446_p12 = scmp.lt.s32.totalorder %s440_s9, %s440_s9 }
  0x21   :  { %p447_p13 = por %p446_p12, %p445_p11 }
  0x23   :  { %p448_p0 = pnand %p447_p13, %p441_p10 }
  0x25   :  { %451 = shalt.err (!%p448_p0)
}
  0x26   :  { %50 = dma.hbm_to_vmem [thread:$0]  %s578_s3, 1024, %s45_s30, [#allocation9], %s490_s24, %s490_s24, %s491_s25  }
  0x27   :  { %478 = dma.done.wait [#allocation6], 128  }
  0x28   :  { %479 = vsyncadd [#allocation6], 4294967168 }
  0x29   :  { %480 = dma.done.wait [#allocation9], 1152  }
  0x2a   :  { %481 = vsyncadd [#allocation9], 4294966144  ;;  %s545_s1 = smov 0  }
  0x2b LB: > { %s551_s11 = sshll.u32 %s486_s1, 3  ;;  %vm124_vm0 = vcmask 1040384   ;;  %vm126_vm1 = vcmask 1041408   ;;  %vm128_vm2 = vcmask 1042432   ;;  %vm130_vm3 = vcmask 1043456   ;;  %s69_s1 = sadd.s32 1, %s486_s1   ;;  %s486_s1 = sphi %s545_s1, %s69_s1  }
  0x2c   : > { %s72_s3 = sld [smem:[#allocation4 + %s551_s11]]  ;;  %s75_s12 = sadd.s32 1, %s551_s11  ;;  %vm132_vm4 = vcmask 1044480   ;;  %vm134_vm5 = vcmask 1045504   ;;  %vm136_vm6 = vcmask 1046528  }
  0x2d   : > { %s76_s13 = sld [smem:[#allocation4 + %s75_s12]]  ;;  %s79_s14 = sadd.s32 2, %s551_s11 }
  0x2e   : > { %s80_s15 = sld [smem:[#allocation4 + %s79_s14]]  ;;  %s83_s16 = sadd.s32 3, %s551_s11 }
  0x2f   : > { %s84_s17 = sld [smem:[#allocation4 + %s83_s16]]  ;;  %s87_s18 = sadd.s32 4, %s551_s11 }
  0x30   : > { %s88_s19 = sld [smem:[#allocation4 + %s87_s18]]  ;;  %s91_s20 = sadd.s32 5, %s551_s11 }
  0x31   : > { %s92_s21 = sld [smem:[#allocation4 + %s91_s20]]  ;;  %s95_s22 = sadd.s32 6, %s551_s11 }
  0x32   : > { %s96_s23 = sld [smem:[#allocation4 + %s95_s22]]  ;;  %s99_s0 = sadd.s32 7, %s551_s11 }
  0x33   : > { %s73_s26 = scalar_lea.vmem [#allocation5], %s72_s3  ;;  %s77_s27 = scalar_lea.vmem [#allocation5], %s76_s13 }
  0x34   : > { %v74_v0 = vld [vmem:[%s73_s26] sm:$0x1]  ;;  %s100_s28 = sld [smem:[#allocation4 + %s99_s0]]  ;;  %s81_s29 = scalar_lea.vmem [#allocation5], %s80_s15 }
  0x35   : > { %v78_v1 = vld [vmem:[%s77_s27] sm:$0x1]  ;;  %s85_s30 = scalar_lea.vmem [#allocation5], %s84_s17  ;;  %s138_s2 = scalar_lea.vmem [#allocation2], %s551_s11 }
  0x36   : > { %v82_v2 = vld [vmem:[%s81_s29] sm:$0x1]  ;;  %v104_v3 = vrot.slane %v78_v1, 7  ;;  %s89_s6 = scalar_lea.vmem [#allocation5], %s88_s19  ;;  %p66_p1 = scmp.ge.s32.totalorder %s69_s1, 2  }
  0x37   : > { %v86_v4 = vld [vmem:[%s85_s30] sm:$0x1]  ;;  %v107_v5 = vrot.slane %v82_v2, 6  ;;  %s93_s7 = scalar_lea.vmem [#allocation5], %s92_s21  ;;  %v375_v22 = vld [vmem:[#allocation10 + $0x38] sm:$0xff] (%p66_p1)   ;;  %v494_v23 = vmov (%p66_p1), 0.0  }
  0x38   : > { %v90_v6 = vld [vmem:[%s89_s6] sm:$0x1]  ;;  %v110_v7 = vrot.slane %v86_v4, 5  ;;  %v125_v8 = vsel %vm124_vm0, %v74_v0, %v104_v3  ;;  %s97_s8 = scalar_lea.vmem [#allocation5], %s96_s23  ;;  %338 = vmatprep.subr.bf16.mxu0 (%p66_p1), %v494_v23  ;;  %v376_v24 = vld [vmem:[#allocation10 + $0x30] sm:$0xff] (%p66_p1)   ;;  %vm495_vm7 = vmmov (%p66_p1), 0  }
  0x39   : > { %v94_v9 = vld [vmem:[%s93_s7] sm:$0x1]  ;;  %v113_v10 = vrot.slane %v90_v6, 4  ;;  %v127_v11 = vsel %vm126_vm1, %v125_v8, %v107_v5  ;;  %339 = vmatpush3.bf16.msra.mxu0 (%p66_p1), %v375_v22  ;;  %354 = vmatprep.mubr.msk.bf16.mxu0 (%p66_p1), %vm495_vm7, %v494_v23  ;;  %v377_v25 = vld [vmem:[#allocation10 + $0x28] sm:$0xff] (%p66_p1)   ;;  %v379_v27 = vld [vmem:[#allocation10 + $0x18] sm:$0xff] (%p66_p1)   ;;  %s496_s11 = smov (%p66_p1), [#allocation11]  }
  0x3a   : > { %v98_v12 = vld [vmem:[%s97_s8] sm:$0x1]  ;;  %v116_v13 = vrot.slane %v94_v9, 3  ;;  %v129_v14 = vsel %vm128_vm2, %v127_v11, %v110_v7  ;;  %s101_s9 = scalar_lea.vmem [#allocation5], %s100_s28  ;;  %340 = vmatprep.subr.bf16.mxu0 (%p66_p1), %v494_v23  ;;  %v380_v28 = vld [vmem:[#allocation10 + $0x10] sm:$0xff] (%p66_p1)   ;;  %v381_v29 = vld [vmem:[#allocation10 + $0x8] sm:$0xff] (%p66_p1)  }
  0x3b   : > { %v119_v15 = vrot.slane %v98_v12, 2  ;;  %v131_v16 = vsel %vm130_vm3, %v129_v14, %v113_v10  ;;  %v102_v17 = vld [vmem:[%s101_s9] sm:$0x1]  ;;  %68 = sbr.rel (!%p66_p1) target bundleno = 43 (0x2b), region = 64  ;;  %v383_v31 = vld [vmem:[#allocation8] sm:$0xff] (%p66_p1)   ;;  %s281_s3 = sshll.u32 (%p66_p1), %s496_s11, 4  ;;  %s282_s3 = int_to_ptr.vmem [resolvable:$true] %s281_s3 }
  0x3c   : > { %v133_v18 = vsel %vm132_vm4, %v131_v16, %v116_v13  ;;  %v122_v19 = vrot.slane %v102_v17, 1  ;;  %v378_v26 = vld [vmem:[#allocation10 + $0x20] sm:$0xff] (%p66_p1)   ;;  %s452_s12 = scalar_lea.vmem (%p66_p1), %s282_s3, 128  ;;  %p457_p3 = scmp.lt.s32.totalorder (%p66_p1), %s282_s3, %s282_s3 }
  0x3d   : > { %v135_v20 = vsel %vm134_vm5, %v133_v18, %v119_v15  ;;  %341 = vmatpush3.bf16.msra.mxu0 (%p66_p1), %v376_v24  ;;  %v382_v30 = vld [vmem:[#allocation10] sm:$0xff] (%p66_p1)   ;;  %p453_p2 = scmp.ne.s32.totalorder (%p66_p1), %s282_s3, %s452_s12  ;;  %p458_p4 = scmp.lt.s32.totalorder (%p66_p1), %s452_s12, %s452_s12 }
  0x3e   : > { %v137_v21 = vsel %vm136_vm6, %v135_v20, %v122_v19  ;;  %342 = vmatprep.subr.bf16.mxu0 (%p66_p1), %v494_v23  ;;  %v310_v32 = vld [vmem:[%s579_s4] ss:$0 sm:$0xff] (%p66_p1) }
  0x3f   : > { %139 = vst [vmem:[%s138_s2] sm:$0xff] %v137_v21  ;;  %p459_p5 = por (%p66_p1), %p458_p4, %p457_p3 }
  0x41   :  { %343 = vmatpush3.bf16.msra.mxu0 %v377_v25  ;;  %p460_p6 = pnand %p459_p5, %p453_p2 }
  0x42   :  { %344 = vmatprep.subr.bf16.mxu0 %v494_v23 }
  0x45   :  { %345 = vmatpush3.bf16.msra.mxu0 %v378_v26 }
  0x46   :  { %346 = vmatprep.subr.bf16.mxu0 %v494_v23  ;;  %v260_v35 = vld [vmem:[#allocation2] sm:$0xff]  ;;  %v261_v38 = vld [vmem:[#allocation2 + $0x8] sm:$0xff] }
  0x49   :  { %347 = vmatpush3.bf16.msra.mxu0 %v379_v27 }
  0x4a   :  { %348 = vmatprep.subr.bf16.mxu0 %v494_v23 }
  0x4d   :  { %349 = vmatpush3.bf16.msra.mxu0 %v380_v28 }
  0x4e   :  { %350 = vmatprep.subr.bf16.mxu0 %v494_v23 }
  0x51   :  { %351 = vmatpush3.bf16.msra.mxu0 %v381_v29 }
  0x52   :  { %352 = vmatprep.subr.bf16.mxu0 %v494_v23 }
  0x55   :  { %353 = vmatpush3.bf16.msra.mxu0 %v382_v30 }
  0x58   :  { %355 = vmatmul.mubr.bf16.vlgmr.msra.gmra.mxu0 %v383_v31 }
 0x118   :  { %v253_v33 = vpop.f32.mrf.mxu0 }
 0x119   :  { %v254_v34 = vadd.f32 %v310_v32, %v253_v33 }
 0x11a   :  { %v356_v36 = vpop.f32.mrf.mxu0 }
 0x11b   :  { %v262_v39 = vadd.f32 %v260_v35, %v254_v34 }
 0x11c   :  { %v256_v37 = vpop.f32.mrf.mxu0 }
 0x11d   :  { %v257_v40 = vadd.f32 %v310_v32, %v256_v37  ;;  %v264_v43 = vmax.f32 %v262_v39, 0.0 }
 0x11e   :  { %v357_v41 = vpop.f32.mrf.mxu0 }
 0x11f   :  { %v263_v42 = vadd.f32 %v261_v38, %v257_v40 }
 0x121   :  { %v265_v44 = vmax.f32 %v263_v42, 0.0 }
 0x123   :  { %v327_v45 = vpack.c.bf16 %v265_v44, %v264_v43 }
 0x125   :  { %328 = vst [vmem:[#allocation11] sm:$0xff] %v327_v45  }
 0x126   :  { %463 = shalt.err (!%p460_p6)
}
 0x127   :  { %287 = dma.vmem_to_hbm [thread:$0]  %s282_s3, 128, %s580_s5, [#allocation7], %s490_s24, %s490_s24, %s491_s25  }
 0x128   :  { %482 = dma.done.wait [#allocation7], 128  }
 0x129   :  { %483 = vsyncadd [#allocation7], 4294967168 }
 0x12a   :  { %291 = vsyncpa [#allocation6], 1 }
 0x12b   :  { %292 = vsyncpa [#allocation9], 1 }
 0x12c   :  { %293 = vsyncpa [#allocation7], 1 }

</bundles_post_ra>
